<compile_context>
chip_gen: v5e
topology: v5e:2x2
jax: 0.10.0
libtpu: 0.0.40
codegen_flags: <defaults>
</compile_context>

<pallas_src>
import functools

import jax
import jax.numpy as jnp
from jax.experimental import pallas as pl
from jax.experimental.pallas import tpu as pltpu


def _round_up(n: int, m: int) -> int:
    return ((n + m - 1) // m) * m


# ---------------------------------------------------------------------------
# Kernel
# ---------------------------------------------------------------------------
def bail_classifier_kernel(x_ref, w1_ref, b1_ref, w2_ref, b2_ref, o_ref):
    # fc1: bf16 MXU matmul, f32 accumulate; bias add + ReLU in f32 on the VPU.
    x = x_ref[...].astype(jnp.bfloat16)
    h = jnp.dot(x, w1_ref[...], preferred_element_type=jnp.float32)
    h = jnp.maximum(h + b1_ref[...], 0.0)

    # fc2 into the lane-dense padded class axis.  Padded lanes have zero weight
    # columns and bias -1e30 -> exp() underflows to 0; no in-kernel mask needed.
    logits = jnp.dot(h.astype(jnp.bfloat16), w2_ref[...],
                     preferred_element_type=jnp.float32)
    logits = logits + b2_ref[...]

    # Numerically stable softmax over dim=1 (the class axis).
    m = jnp.max(logits, axis=-1, keepdims=True)
    e = jnp.exp(logits - m)
    denom = jnp.sum(e, axis=-1, keepdims=True)
    o_ref[...] = (e * pl.reciprocal(denom, approx=True)).astype(o_ref.dtype)


# ---------------------------------------------------------------------------
# One-time parameter preparation (do NOT re-run per forward call)
# ---------------------------------------------------------------------------
def prepare_params(w1, b1, w2, b2):
    """Pad hidden/class axes to lane width and cast matmul weights to bf16."""
    input_dim, hidden_dim = w1.shape
    out_dim = w2.shape[1]
    h_pad = _round_up(hidden_dim, 128)
    out_pad = _round_up(out_dim, 128)

    # Hidden padding is mathematically inert: zero w1 cols + zero b1 entries give
    # ReLU(0) = 0, and the matching w2 rows are zero.
    w1p = jnp.zeros((input_dim, h_pad), jnp.bfloat16)
    w1p = w1p.at[:, :hidden_dim].set(w1.astype(jnp.bfloat16))
    b1p = jnp.zeros((1, h_pad), jnp.float32).at[:, :hidden_dim].set(b1)

    w2p = jnp.zeros((h_pad, out_pad), jnp.bfloat16)
    w2p = w2p.at[:hidden_dim, :out_dim].set(w2.astype(jnp.bfloat16))
    # Padded class lanes: bias -1e30 => exp(logit - max) == 0 under softmax.
    b2p = jnp.full((1, out_pad), -1e30, jnp.float32).at[:, :out_dim].set(b2)

    return (w1p, b1p, w2p, b2p, out_dim)


# ---------------------------------------------------------------------------
# Tiling / VMEM budgeting
# ---------------------------------------------------------------------------
def _choose_block_b(B, input_dim, h_pad, out_pad, max_block_b, vmem_budget_bytes):
    # Per-batch-row VMEM bytes:
    #   x tile   (f32, double-buffered): 2 * input_dim * 4
    #   out tile (f32, double-buffered): 2 * out_pad  * 4
    #   h intermediate (f32)           :     h_pad    * 4
    per_row = (2 * input_dim + 2 * out_pad + h_pad) * 4
    # Resident (single-buffered) weights in bf16 + f32 biases.
    resident = (input_dim * h_pad + h_pad * out_pad) * 2 + (h_pad + out_pad) * 4

    avail = max(vmem_budget_bytes - resident, 8 * per_row)
    block_b = min(max_block_b, avail // per_row, _round_up(B, 8))
    if B >= 16:
        # Ensure >= 2 grid steps so both v7x TensorCores get work.
        block_b = min(block_b, _round_up(-(-B // 2), 8))
    block_b = max(8, (block_b // 8) * 8)  # second-minor dim must be a mult of 8

    need = resident + (3 * block_b * per_row) // 2  # ~1.5x headroom on tiles
    vmem_limit = int(min(48 << 20, max(32 << 20, need)))
    return block_b, vmem_limit


# ---------------------------------------------------------------------------
# Forward wrapper
# ---------------------------------------------------------------------------
def bail_classifier(x, params, *, max_block_b=1024, vmem_budget_bytes=24 << 20):
    w1p, b1p, w2p, b2p, out_dim = params
    B, input_dim = x.shape
    h_pad = w1p.shape[1]
    out_pad = w2p.shape[1]

    block_b, vmem_limit = _choose_block_b(
        B, input_dim, h_pad, out_pad, max_block_b, vmem_budget_bytes)
    grid = (pl.cdiv(B, block_b),)

    out = pl.pallas_call(
        bail_classifier_kernel,
        out_shape=jax.ShapeDtypeStruct((B, out_pad), jnp.float32),
        grid=grid,
        in_specs=[
            # x: tiled over batch (double-buffered by default).
            pl.BlockSpec((block_b, input_dim), lambda i: (i, 0)),
            # Weights / biases: constant blocks, resident in VMEM, single-buffered.
            pl.BlockSpec((input_dim, h_pad), lambda i: (0, 0),
                         pipeline_mode=pl.Buffered(1)),
            pl.BlockSpec((1, h_pad), lambda i: (0, 0),
                         pipeline_mode=pl.Buffered(1)),
            pl.BlockSpec((h_pad, out_pad), lambda i: (0, 0),
                         pipeline_mode=pl.Buffered(1)),
            pl.BlockSpec((1, out_pad), lambda i: (0, 0),
                         pipeline_mode=pl.Buffered(1)),
        ],
        out_specs=pl.BlockSpec((block_b, out_pad), lambda i: (i, 0)),
        compiler_params=pltpu.CompilerParams(
            dimension_semantics=("parallel",),
            vmem_limit_bytes=vmem_limit),
    )(x, w1p, b1p, w2p, b2p)

    # Strip padded class lanes (batch axis was never padded).
    return out[:, :out_dim]


# ---------------------------------------------------------------------------
# Deterministic init mimicking nn.Linear's uniform(-1/sqrt(fan_in), 1/sqrt(fan_in))
# ---------------------------------------------------------------------------
def init_params(key, input_dim, hidden_dim, output_dim):
    k1, k2, k3, k4 = jax.random.split(key, 4)
    bound1 = 1.0 / (input_dim ** 0.5)
    bound2 = 1.0 / (hidden_dim ** 0.5)
    w1 = jax.random.uniform(k1, (input_dim, hidden_dim), jnp.float32, -bound1, bound1)
    b1 = jax.random.uniform(k2, (1, hidden_dim), jnp.float32, -bound1, bound1)
    w2 = jax.random.uniform(k3, (hidden_dim, output_dim), jnp.float32, -bound2, bound2)
    b2 = jax.random.uniform(k4, (1, output_dim), jnp.float32, -bound2, bound2)
    return w1, b1, w2, b2


if __name__ == "__main__":
    key = jax.random.PRNGKey(0)
    kx, kp = jax.random.split(key)

    # Small shapes; batch=20 (not a multiple of 8) + max_block_b=8 exercises the
    # ragged last grid tile AND a multi-step grid with resident weights.
    batch, input_dim, hidden_dim, output_dim = 20, 32, 32, 8
    x = jax.random.normal(kx, (batch, input_dim), jnp.float32)
    w1, b1, w2, b2 = init_params(kp, input_dim, hidden_dim, output_dim)

    params = prepare_params(w1, b1, w2, b2)          # one-time prep
    out = bail_classifier(x, params, max_block_b=8)  # forward
    out = jax.block_until_ready(out)

    # Reference in plain JAX / f32 (tolerances loosened for bf16 matmul operands
    # and approximate reciprocal).
    h_ref = jnp.maximum(x @ w1 + b1, 0.0)
    ref = jax.nn.softmax(h_ref @ w2 + b2, axis=1)
    assert out.shape == (batch, output_dim), out.shape
    assert jnp.allclose(out, ref, atol=1e-2, rtol=1e-2), "mismatch vs reference"
    assert jnp.allclose(jnp.sum(out, axis=1), 1.0, atol=1e-2)

    print("KERNEL_OK")
</pallas_src>

<mosaic_0001>
module attributes {stable_mosaic.version = 11 : i64} {
  func.func @bail_classifier_kernel(%arg0: i32, %arg1: memref<8x32xf32, #tpu.memory_space<vmem>>, %arg2: memref<32x128xbf16, #tpu.memory_space<vmem>>, %arg3: memref<1x128xf32, #tpu.memory_space<vmem>>, %arg4: memref<128x128xbf16, #tpu.memory_space<vmem>>, %arg5: memref<1x128xf32, #tpu.memory_space<vmem>>, %arg6: memref<8x128xf32, #tpu.memory_space<vmem>>) attributes {dimension_semantics = [#tpu.dimension_semantics<parallel>], iteration_bounds = array<i64: 3>, scalar_prefetch = 0 : i64, scratch_operands = 0 : i64, tpu.core_type = #tpu.core_type<tc>, window_params = [{transform_indices = @transform_0, window_bounds = array<i64: 8, 32>}, {pipeline_mode = #tpu.pipeline_mode<synchronous>, transform_indices = @transform_1, window_bounds = array<i64: 32, 128>}, {pipeline_mode = #tpu.pipeline_mode<synchronous>, transform_indices = @transform_2, window_bounds = array<i64: 1, 128>}, {pipeline_mode = #tpu.pipeline_mode<synchronous>, transform_indices = @transform_3, window_bounds = array<i64: 128, 128>}, {pipeline_mode = #tpu.pipeline_mode<synchronous>, transform_indices = @transform_4, window_bounds = array<i64: 1, 128>}, {transform_indices = @transform_5, window_bounds = array<i64: 8, 128>}]} {
    %c0 = arith.constant 0 : index
    %c0_0 = arith.constant 0 : index
    %0 = vector.load %arg1[%c0, %c0_0] : memref<8x32xf32, #tpu.memory_space<vmem>>, vector<8x32xf32>
    %1 = arith.truncf %0 : vector<8x32xf32> to vector<8x32xbf16>
    %c0_1 = arith.constant 0 : index
    %c0_2 = arith.constant 0 : index
    %2 = vector.load %arg2[%c0_1, %c0_2] : memref<32x128xbf16, #tpu.memory_space<vmem>>, vector<32x128xbf16>
    %cst = arith.constant dense<0.000000e+00> : vector<8x128xf32>
    %3 = tpu.matmul %1, %2, %cst {dimension_numbers = #tpu.dot_dimension_numbers<[1], [0], [0], [1], [0, 0, 1, 1], [], []>} : vector<8x32xbf16>, vector<32x128xbf16>, vector<8x128xf32> -> vector<8x128xf32>
    %c0_3 = arith.constant 0 : index
    %c0_4 = arith.constant 0 : index
    %4 = vector.load %arg3[%c0_3, %c0_4] : memref<1x128xf32, #tpu.memory_space<vmem>>, vector<1x128xf32>
    %5 = vector.broadcast %4 : vector<1x128xf32> to vector<8x128xf32>
    %6 = arith.addf %3, %5 : vector<8x128xf32>
    %cst_5 = arith.constant 0.000000e+00 : f32
    %7 = vector.broadcast %cst_5 : f32 to vector<8x128xf32>
    %8 = arith.maximumf %6, %7 : vector<8x128xf32>
    %9 = arith.truncf %8 : vector<8x128xf32> to vector<8x128xbf16>
    %c0_6 = arith.constant 0 : index
    %c0_7 = arith.constant 0 : index
    %10 = vector.load %arg4[%c0_6, %c0_7] : memref<128x128xbf16, #tpu.memory_space<vmem>>, vector<128x128xbf16>
    %cst_8 = arith.constant dense<0.000000e+00> : vector<8x128xf32>
    %11 = tpu.matmul %9, %10, %cst_8 {dimension_numbers = #tpu.dot_dimension_numbers<[1], [0], [0], [1], [0, 0, 1, 1], [], []>} : vector<8x128xbf16>, vector<128x128xbf16>, vector<8x128xf32> -> vector<8x128xf32>
    %c0_9 = arith.constant 0 : index
    %c0_10 = arith.constant 0 : index
    %12 = vector.load %arg5[%c0_9, %c0_10] : memref<1x128xf32, #tpu.memory_space<vmem>>, vector<1x128xf32>
    %13 = vector.broadcast %12 : vector<1x128xf32> to vector<8x128xf32>
    %14 = arith.addf %11, %13 : vector<8x128xf32>
    %cst_11 = arith.constant dense<0xFF800000> : vector<8xf32>
    %15 = vector.multi_reduction <maximumf>, %14, %cst_11 [1] : vector<8x128xf32> to vector<8xf32>
    %16 = vector.shape_cast %15 : vector<8xf32> to vector<8x1xf32>
    %17 = vector.broadcast %16 : vector<8x1xf32> to vector<8x128xf32>
    %18 = arith.subf %14, %17 : vector<8x128xf32>
    %19 = math.exp %18 : vector<8x128xf32>
    %cst_12 = arith.constant dense<0.000000e+00> : vector<8xf32>
    %20 = vector.multi_reduction <add>, %19, %cst_12 [1] : vector<8x128xf32> to vector<8xf32>
    %21 = vector.shape_cast %20 : vector<8xf32> to vector<8x1xf32>
    %22 = tpu.reciprocal %21 {approx = true} : vector<8x1xf32> -> vector<8x1xf32>
    %23 = vector.broadcast %22 : vector<8x1xf32> to vector<8x128xf32>
    %24 = arith.mulf %19, %23 : vector<8x128xf32>
    %c0_13 = arith.constant 0 : index
    %c0_14 = arith.constant 0 : index
    %25 = vector.load %arg6[%c0_13, %c0_14] : memref<8x128xf32, #tpu.memory_space<vmem>>, vector<8x128xf32>
    tpu.vector_store %arg6[%c0_13, %c0_14], %24 {strides = array<i32>} : memref<8x128xf32, #tpu.memory_space<vmem>>, vector<8x128xf32>,
    return
  }
  func.func @transform_0(%arg0: i32) -> (i32, i32) {
    %c0_i32 = arith.constant 0 : i32
    %c0_i32_0 = arith.constant 0 : i32
    return %arg0, %c0_i32 : i32, i32
  }
  func.func @transform_1(%arg0: i32) -> (i32, i32) {
    %c0_i32 = arith.constant 0 : i32
    %c0_i32_0 = arith.constant 0 : i32
    %c0_i32_1 = arith.constant 0 : i32
    return %c0_i32, %c0_i32_0 : i32, i32
  }
  func.func @transform_2(%arg0: i32) -> (i32, i32) {
    %c0_i32 = arith.constant 0 : i32
    %c0_i32_0 = arith.constant 0 : i32
    %c0_i32_1 = arith.constant 0 : i32
    return %c0_i32, %c0_i32_0 : i32, i32
  }
  func.func @transform_3(%arg0: i32) -> (i32, i32) {
    %c0_i32 = arith.constant 0 : i32
    %c0_i32_0 = arith.constant 0 : i32
    %c0_i32_1 = arith.constant 0 : i32
    return %c0_i32, %c0_i32_0 : i32, i32
  }
  func.func @transform_4(%arg0: i32) -> (i32, i32) {
    %c0_i32 = arith.constant 0 : i32
    %c0_i32_0 = arith.constant 0 : i32
    %c0_i32_1 = arith.constant 0 : i32
    return %c0_i32, %c0_i32_0 : i32, i32
  }
  func.func @transform_5(%arg0: i32) -> (i32, i32) {
    %c0_i32 = arith.constant 0 : i32
    %c0_i32_0 = arith.constant 0 : i32
    return %arg0, %c0_i32 : i32, i32
  }
}

</mosaic_0001>

<bundles_post_ra>
// kernel: tpu_custom_call.1
= control target key start
LH: loop header
LB: loop body
LE: loop exit
PB: predicated region body
PF: predicated region fallthrough
CT: control target
= control target key end

     0   :  { %10 = vsyncpa [#allocation3], 0  ;;  %s1004_s0 = inlined_call_operand.hbm [shape: f32[20,32], index: 0, kind: input, shape index: {}]   ;;  %s1005_s1 = inlined_call_operand.hbm [shape: bf16[32,128], index: 1, kind: input, shape index: {}]   ;;  %s1006_s2 = inlined_call_operand.vmem [shape: f32[1,128], index: 2, kind: input, shape index: {}]   ;;  %s1007_s3 = inlined_call_operand.hbm [shape: bf16[128,128], index: 3, kind: input, shape index: {}]   ;;  %s1008_s4 = inlined_call_operand.vmem [shape: f32[1,128], index: 4, kind: input, shape index: {}]   ;;  %s1009_s5 = inlined_call_operand.hbm [shape: f32[20,128], index: 5, kind: output, shape index: {}]  }
   0x1   :  { %12 = vsyncpa [#allocation3 + $0x1], 0 }
   0x2   :  { %13 = vsyncpa [#allocation6], 0 }
   0x3   :  { %14 = vsyncpa [#allocation4], 0 }
   0x4   :  { %16 = vsyncpa [#allocation4 + $0x1], 0  ;;  %s851_s18 = smov 0   ;;  %s853_s19 = smov 0  }
   0x5   :  { %s855_s20 = smov 0   ;;  %s857_s21 = smov 0  }
   0x6 LB: > { %s174_s24 = sshll.u32 %s1005_s1, 4  ;;  %s875_s25 = sadd.s32 4294967295, %s815_s21   ;;  %s815_s21 = sphi %s857_s21, %s1019_s21   ;;  %s811_s20 = sphi %s855_s20, %s1018_s20   ;;  %s807_s19 = sphi %s853_s19, %s1017_s19   ;;  %s803_s18 = sphi %s851_s18, %s1016_s18   ;;  %s175_s24 = int_to_ptr.hbm [resolvable:$true] %s174_s24 }
   0x7   : > { %p514_p0 = scmp.ge.s32.totalorder %s815_s21, 1  ;;  %p43_p1 = scmp.eq.s32.totalorder %s875_s25, 0 }
   0x8   : > { %p163_p2 = scmp.lt.s32.totalorder %s815_s21, 4  ;;  %s817_s27 = smov [#allocation5]  }
   0x9   : > { %s176_s28 = sshll.u32 %s817_s27, 4  ;;  %s191_s6 = sshll.u32 %s1007_s3, 4  ;;  %s177_s28 = int_to_ptr.vmem [resolvable:$true] %s176_s28  ;;  %s192_s6 = int_to_ptr.hbm [resolvable:$true] %s191_s6 }
   0xa   : > { %p880_p3 = pnand %p514_p0, %p163_p2  ;;  %s818_s7 = smov [#allocation7]  }
   0xb   : > { %s193_s8 = sshll.u32 %s818_s7, 4  ;;  %s819_s9 = smov 64   ;;  %s194_s8 = int_to_ptr.vmem [resolvable:$true] %s193_s8 }
   0xc   : > { %p592_p4 = pneg %p880_p3  ;;  %s820_s10 = smov 4  }
   0xd   : > { %s513_s11 = sadd.s32 4294967294, %s815_s21   ;;  %s893_s12 = sadd.s32 1, %s815_s21  }
   0xe   : > { %p593_p5 = pnand %p592_p4, %p43_p1  ;;  %s26_s13 = ssub.s32 %s815_s21, %s893_s12 }
   0xf   : > { %s29_s14 = sadd.s32 1, %s811_s20  ;;  %p27_p6 = scmp.eq.s32.totalorder %s26_s13, 0 }
  0x10   : > { %595 = dma.hbm_to_vmem [thread:$0]  (!%p593_p5), %s175_s24, 256, %s177_s28, [#allocation6], %s819_s9, %s819_s9, %s820_s10  }
  0x11   : > { %598 = dma.hbm_to_vmem [thread:$0]  (!%p593_p5), %s192_s6, 1024, %s194_s8, [#allocation6], %s819_s9, %s819_s9, %s820_s10  }
  0x12   : > { %p36_p7 = scmp.ne.s32.totalorder %s811_s20, %s807_s19  ;;  %p37_p8 = scmp.eq.s32.totalorder %s815_s21, 0 }
  0x13   : > { %p42_p9 = scmp.ne.s32.totalorder %s807_s19, %s803_s18  ;;  %p150_p12 = scmp.eq.s32.totalorder %s875_s25, 2 }
  0x14   : > { %s904_s15 = scalar_select %p27_p6, %s811_s20, %s29_s14  }
  0x15   : > { %p906_p10 = por %p37_p8, %p36_p7  ;;  %p912_p11 = por %p43_p1, %p42_p9 }
  0x16   : > { %p156_p13 = scmp.eq.s32.totalorder %s513_s11, 2  ;;  %p609_p0 = scmp.lt.s32.totalorder %s815_s21, 3 }
  0x17   : > { %s210_s22 = sand.u32 1, %s811_s20   ;;  %p919_p2 = por %p150_p12, %p36_p7 }
  0x18   : > { %p923_p4 = por %p156_p13, %p42_p9  ;;  %s518_s27 = sshll.u32 %s210_s22, 3 }
  0x19   : > { %s519_s28 = sshll.u32 %s815_s21, 3  ;;  %s214_s7 = scalar_lea.vmem [#allocation2], %s518_s27 }
  0x1a   : > { %s218_s6 = scalar_lea.hbm %s1004_s0, %s519_s28  ;;  %s222_s8 = sshll.u32 %s214_s7, 4  ;;  %s223_s8 = int_to_ptr.vmem [resolvable:$true] %s222_s8 }
  0x1b   : > { %s220_s9 = sshll.u32 %s218_s6, 4  ;;  %p933_p5 = pnand %p609_p0, %p906_p10  ;;  %s221_s9 = int_to_ptr.hbm [resolvable:$true] %s220_s9 }
  0x1c   : > { %s211_s11 = scalar_lea.sflag [#allocation3], %s210_s22  ;;  %s715_s13 = sshra.s32 %s221_s9, 4  ;;  %s716_s13 = int_to_ptr.hbm [resolvable:$true] %s715_s13 }
  0x1d   : > { %s717_s14 = scalar_lea.hbm %s716_s13, 8  ;;  %p719_p7 = pneg %p933_p5 }
  0x1e   : > { %p718_p6 = scmp.ne.s32.totalorder %s716_s13, %s717_s14  ;;  %s722_s29 = scalar_lea.hbm %s1004_s0, 24 }
  0x1f   : > { %p723_p10 = scmp.lt.s32.totalorder %s716_s13, %s1004_s0  ;;  %p724_p12 = scmp.lt.s32.totalorder %s722_s29, %s717_s14 }
  0x20   : > { %p720_p8 = pnand %p719_p7, %p718_p6 }
  0x21   : > { %p725_p13 = por %p724_p12, %p723_p10 }
  0x22   : > { %p721_p9 = pneg %p720_p8 }
  0x24   : > { %p726_p0 = pnand %p725_p13, %p721_p9 }
  0x26   : > { %729 = shalt.err (!%p726_p0)
}
  0x27   : > { %602 = dma.hbm_to_vmem [thread:$0]  (!%p933_p5), %s221_s9, 128, %s223_s8, %s211_s11  }
  0x28   : > { %231 = sbr.rel (%p880_p3) target bundleno = 571 (0x23b), region = 40  ;;  %s950_s22 = sand.u32 (!%p880_p3), 1, %s807_s19  }
  0x29   : > { %s521_s6 = sshll.u32 (!%p880_p3), %s950_s22, 3  ;;  %s234_s7 = scalar_lea.sflag (!%p880_p3), [#allocation3], %s950_s22 }
  0x2a   : > { %s237_s13 = scalar_lea.vmem (!%p880_p3), [#allocation2], %s521_s6 }
  0x2d   : > { %790 = dma.done.wait (%p912_p11), %s234_s7, 128  }
  0x2e   : > { %792 = vsyncadd (%p912_p11), %s234_s7, 4294967168 }
  0x2f   : > { %794 = dma.done.wait (%p43_p1), [#allocation6], 1280  }
  0x30   : > { %796 = vsyncadd (%p43_p1), [#allocation6], 4294966016  ;;  %v571_v0 = vld [vmem:[#allocation5 + $0x8] sm:$0xff]  ;;  %v570_v2 = vld [vmem:[#allocation5] sm:$0xff]  ;;  %vm298_vm0 = vcmask 261120   ;;  %s567_s10 = sshll.u32 %s875_s25, 3 }
  0x31   : > { %v579_v1 = vld [vmem:[#allocation7 + $0x38] sm:$0xff]  ;;  %308 = vmatpush.bf16.msra.mxu0 %v571_v0  ;;  %v276_v3 = vld [vmem:[%s237_s13] sm:$0xff]  ;;  %v578_v4 = vld [vmem:[#allocation7 + $0x30] sm:$0xff]  ;;  %s419_s27 = scalar_lea.hbm %s1009_s5, %s567_s10  ;;  %s274_s28 = scalar_lea.vmem [#allocation8], %s521_s6 }
  0x32   : > { %385 = vmatpush.bf16.msra.mxu1 %v579_v1  ;;  %v277_v5 = vpack.c.bf16 %v276_v3, %v276_v3  ;;  %v577_v6 = vld [vmem:[#allocation7 + $0x28] sm:$0xff]  ;;  %v576_v7 = vld [vmem:[#allocation7 + $0x20] sm:$0xff]  ;;  %v575_v8 = vld [vmem:[#allocation7 + $0x18] sm:$0xff]  ;;  %s421_s29 = sshll.u32 %s274_s28, 4  ;;  %s423_s30 = sshll.u32 %s419_s27, 4  ;;  %s422_s29 = int_to_ptr.vmem [resolvable:$true] %s421_s29  ;;  %s424_s30 = int_to_ptr.hbm [resolvable:$true] %s423_s30 }
  0x33   : > { %v574_v9 = vld [vmem:[#allocation7 + $0x10] sm:$0xff]  ;;  %v573_v10 = vld [vmem:[#allocation7 + $0x8] sm:$0xff]  ;;  %v572_v11 = vld [vmem:[#allocation7] sm:$0xff]  ;;  %s409_s16 = scalar_lea.sflag [#allocation4], %s950_s22  ;;  %s759_s7 = sshra.s32 %s424_s30, 4  ;;  %s760_s7 = int_to_ptr.hbm [resolvable:$true] %s759_s7 }
  0x34   : > { %v649_v12 = vld [vmem:[%s1006_s2] ss:$0 sm:$0xff]  ;;  %s761_s25 = scalar_lea.hbm %s760_s7, 8  ;;  %s765_s17 = scalar_lea.hbm %s1009_s5, 24 }
  0x35   : > { %309 = vmatpush.bf16.msra.mxu0 %v570_v2  ;;  %v650_v18 = vld [vmem:[%s1008_s4] ss:$0 sm:$0xff]  ;;  %p762_p1 = scmp.ne.s32.totalorder %s760_s7, %s761_s25  ;;  %p766_p5 = scmp.lt.s32.totalorder %s760_s7, %s1009_s5 }
  0x36   : > { %386 = vmatpush.bf16.msra.mxu1 %v578_v4  ;;  %p767_p6 = scmp.lt.s32.totalorder %s765_s17, %s761_s25 }
  0x37   : > { %p763_p3 = pnand %p762_p1, %p919_p2 }
  0x38   : > { %533 = vmatmul.msk.bf16.vlgmr.msra.gmra.mxu0 %vm298_vm0, %v277_v5  ;;  %p768_p7 = por %p767_p6, %p766_p5 }
  0x39   : > { %p764_p11 = pneg %p763_p3 }
  0x3a   : > { %387 = vmatpush.bf16.msra.mxu1 %v577_v6 }
  0x3b   : > { %p769_p8 = pnand %p768_p7, %p764_p11 }
  0x3e   : > { %388 = vmatpush.bf16.msra.mxu1 %v576_v7 }
  0x42   : > { %389 = vmatpush.bf16.msra.mxu1 %v575_v8 }
  0x46   : > { %390 = vmatpush.bf16.msra.mxu1 %v574_v9 }
  0x4a   : > { %391 = vmatpush.bf16.msra.mxu1 %v573_v10 }
  0x4e   : > { %392 = vmatpush.bf16.msra.mxu1 %v572_v11 }
  0xb5   : > { %v311_v13 = vpop.f32.mrf.mxu0 }
  0xb6   : > { %v312_v14 = vadd.f32 %v649_v12, %v311_v13 }
  0xb8   : > { %v315_v15 = vmax.f32 %v312_v14, 0.0 }
  0xba   : > { %v316_v16 = vpack.c.bf16 %v315_v15, %v315_v15 }
  0xbc   : > { %393 = vmatmul.bf16.vlgmr.msra.gmra.mxu1 %v316_v16 }
  0xbd   : > { %v313_v17 = vpop.f32.mrf.mxu0 }
 0x139   : > { %v394_v19 = vpop.f32.mrf.mxu1 }
 0x13a   : > { %v395_v20 = vadd.f32 %v650_v18, %v394_v19 }
 0x13c   : > { %398 = vmax.xlane.f32.xlu0 %v395_v20 }
 0x141   : > { %v396_v21 = vpop.f32.mrf.mxu1 }
 0x1af   : > { %v399_v22 = vpop.xlane.xlu0 %398 }
 0x1b0   : > { %v400_v23 = vsub.f32 %v395_v20, %v399_v22 }
 0x1b2   : > { %v401_v24 = vmul.f32 1.442695, %v400_v23 }
 0x1b4   : > { %651 = vpow2.f32 %v401_v24 }
 0x1ba   : > { %v652_v25 = vpop.eup %651 }
 0x1bb   : > { %403 = vadd.xlane.f32.xlu0 %v652_v25 }
 0x22e   : > { %v404_v26 = vpop.xlane.xlu0 %403 }
 0x22f   : > { %653 = vrcp.f32 %v404_v26 }
 0x235   : > { %v654_v27 = vpop.eup %653 }
 0x236   : > { %v406_v28 = vmul.f32 %v654_v27, %v652_v25 }
 0x238   : > { %407 = vst [vmem:[%s274_s28] sm:$0xff] %v406_v28 }
 0x239   : > { %772 = shalt.err (!%p769_p8)
}
 0x23a   : > { %590 = dma.vmem_to_hbm [thread:$0]  (%p919_p2), %s422_s29, 128, %s424_s30, %s409_s16  }
 0x23b PF: > { %p612_p9 = scmp.ge.s32.totalorder %s815_s21, 2  ;;  %s435_s22 = sand.u32 1, %s803_s18  }
 0x23c   : > { %s436_s9 = scalar_lea.sflag [#allocation4], %s435_s22 }
 0x23d   : > { %p604_p10 = pnand %p612_p9, %p923_p4 }
 0x23f   : > { %p605_p12 = pneg %p604_p10 }
 0x241   : > { %798 = dma.done.wait (%p605_p12), %s436_s9, 128  }
 0x242   : > { %800 = vsyncadd (%p605_p12), %s436_s9, 4294967168  ;;  %p19_p13 = scmp.ge.s32.totalorder %s893_s12, 5   ;;  %s1016_s18 = smov %s807_s19 }
 0x243   : > { %s1017_s19 = smov %s811_s20  ;;  %s1018_s20 = smov %s904_s15 }
 0x244   : > { %s1019_s21 = smov %s893_s12  ;;  %21 = sbr.rel (!%p19_p13) target bundleno = 6 (0x6), region = 93 }
 0x249   :  { %442 = vsyncpa [#allocation3], 1 }
 0x24a   :  { %444 = vsyncpa [#allocation3 + $0x1], 1 }
 0x24b   :  { %445 = vsyncpa [#allocation6], 1 }
 0x24c   :  { %446 = vsyncpa [#allocation4], 1 }
 0x24d   :  { %448 = vsyncpa [#allocation4 + $0x1], 1 }

</bundles_post_ra>
